<compile_context>
chip_gen: v6e
topology: v6e:2x2x1
jax: 0.10.0
libtpu: 0.0.40
codegen_flags: <defaults>
</compile_context>

<pallas_src>
import functools

import jax
import jax.numpy as jnp
from jax import lax
from jax.experimental import pallas as pl
from jax.experimental.pallas import tpu as pltpu


def _mha_kernel(q_in_ref, k_ref, wp_ref, wo_ref, bo_ref, out_ref, acc_ref,
                *, heads_per_step, head_dim, approx_recip):
    """One (batch, q-tile, head-group) step per grid point.

    q_in_ref : (1, TQ, M)        query activations tile (compute dtype)
    k_ref    : (1, HP, Lk, D)    precomputed per-head K (== V) slabs (compute dtype)
    wp_ref   : (HP*D, M)         rows of W_proj (native (out, in) layout)
    wo_ref   : (HP*D, M)         rows of W_out^T
    bo_ref   : (1, M)            output bias (f32)
    out_ref  : (1, TQ, M)        output tile (resident across the head axis)
    acc_ref  : (TQ, M) f32       VMEM accumulator over heads
    """
    hg = pl.program_id(2)
    cdt = wp_ref.dtype                        # MXU input dtype (accum stays f32)
    D = head_dim
    HP = heads_per_step

    x_q = q_in_ref[0]                         # (TQ, M), already compute dtype
    wp_blk = wp_ref[...]                      # (HP*D, M)
    wo_blk = wo_ref[...]                      # (HP*D, M)

    # NT dot_general: contract over the full feature dim M; weights consumed
    # untransposed (the MXU handles the "transpose" for free).  Emitting the
    # result directly in compute dtype avoids an explicit cast pass.
    dn_nt = (((1,), (1,)), ((), ()))
    q_blk = lax.dot_general(x_q, wp_blk, dn_nt,
                            preferred_element_type=cdt)        # (TQ, HP*D)

    @pl.when(hg == 0)
    def _():
        # Fold the output bias into the accumulator init.
        acc_ref[...] = jnp.broadcast_to(bo_ref[...], acc_ref.shape)

    for p in range(HP):                       # tiny static head loop (unrolled)
        q_h = q_blk[:, p * D:(p + 1) * D]     # (TQ, D)
        k_h = k_ref[0, p]                     # (Lk, D); value == key in the module
        wo_h = wo_blk[p * D:(p + 1) * D, :]   # (D, M)

        # Unscaled logits q_h @ k_h^T (matches torch.einsum('bqhd,bkhd->bhqk')),
        # accumulated in f32.
        s = lax.dot_general(q_h, k_h, dn_nt,
                            preferred_element_type=jnp.float32)   # (TQ, Lk)
        s = s - jnp.max(s, axis=-1, keepdims=True)
        p_un = jnp.exp(s)
        l = jnp.sum(p_un, axis=-1, keepdims=True)                 # (TQ, 1)

        ctx = jnp.dot(p_un.astype(cdt), k_h,
                      preferred_element_type=jnp.float32)         # (TQ, D)
        # Normalize AFTER the PV matmul: (TQ, D) elements instead of (TQ, Lk).
        if approx_recip:
            ctx = ctx * pl.reciprocal(l, approx=True)   # EUP slot, bf16 path only
        else:
            ctx = ctx / l                               # exact for the f32 path

        # This head's contribution to the output projection:
        #   ctx @ W_out[:, h*D:(h+1)*D]^T  ==  ctx @ wo_h
        acc_ref[...] += jnp.dot(ctx.astype(cdt), wo_h,
                                preferred_element_type=jnp.float32)  # (TQ, M)

    @pl.when(hg == pl.num_programs(2) - 1)
    def _():
        out_ref[0] = acc_ref[...].astype(out_ref.dtype)


def multi_head_attention(inputs_q, inputs_kv, w_proj, w_out, b_out, *,
                         num_heads, head_dim, q_tile=512, heads_per_step=1,
                         compute_dtype=None,
                         vmem_limit_bytes=64 * 1024 * 1024):
    """inputs_q: (B, Lq, M), inputs_kv: (B, Lk, M), M = num_heads * head_dim.

    w_proj, w_out are PyTorch Linear weights of shape (out_features, in_features)
    = (M, M); b_out has shape (M,).  Returns (B, Lq, M) in inputs_q.dtype.
    compute_dtype (e.g. jnp.bfloat16) controls the MXU input precision;
    accumulation is always f32.  heads_per_step > 1 is recommended when
    head_dim < 128 (lane-dense projection outputs on v6e/v7x).
    """
    B, Lq, M = inputs_q.shape
    _, Lk, _ = inputs_kv.shape
    H, D = num_heads, head_dim
    assert M == H * D, "feature dim must equal num_heads * head_dim"
    HP = min(heads_per_step, H)
    assert H % HP == 0, "num_heads must be divisible by heads_per_step"

    cdt = compute_dtype if compute_dtype is not None else inputs_q.dtype

    tq = min(q_tile, Lq)
    assert Lq % tq == 0, "Lq must be divisible by the query tile size"

    # ---- wrapper-side one-time prep (plain XLA ops) -------------------------
    # Hoist the K/V projection: it depends only on (batch, head), so compute it
    # once instead of once per q-tile inside the kernel.  value == key because
    # the module applies the same projection to inputs_kv twice.
    kv_proj = jnp.einsum('bkm,nm->bkn', inputs_kv, w_proj)          # (B, Lk, M)
    k_heads = kv_proj.reshape(B, Lk, H, D).transpose(0, 2, 1, 3)    # (B, H, Lk, D)
    k_heads = k_heads.astype(cdt)

    xq = inputs_q.astype(cdt)                  # pre-cast activations (bf16 path)
    wp = w_proj.astype(cdt)                    # native (out, in) layout
    wo_t = jnp.transpose(w_out).astype(cdt)    # (in, out): per-head slab = row block
    bo = b_out.reshape(1, M).astype(jnp.float32)

    grid = (B, Lq // tq, H // HP)

    kernel = functools.partial(
        _mha_kernel, heads_per_step=HP, head_dim=D,
        approx_recip=(jnp.dtype(cdt) != jnp.dtype(jnp.float32)))

    return pl.pallas_call(
        kernel,
        out_shape=jax.ShapeDtypeStruct((B, Lq, M), inputs_q.dtype),
        grid=grid,
        in_specs=[
            pl.BlockSpec((1, tq, M), lambda b, qi, hg: (b, qi, 0)),        # q tile
            pl.BlockSpec((1, HP, Lk, D), lambda b, qi, hg: (b, hg, 0, 0)), # K(=V) heads
            pl.BlockSpec((HP * D, M), lambda b, qi, hg: (hg, 0)),          # W_proj rows
            pl.BlockSpec((HP * D, M), lambda b, qi, hg: (hg, 0)),          # W_out^T rows
            pl.BlockSpec((1, M), lambda b, qi, hg: (0, 0)),                # output bias
        ],
        out_specs=pl.BlockSpec((1, tq, M), lambda b, qi, hg: (b, qi, 0)),
        scratch_shapes=[pltpu.VMEM((tq, M), jnp.float32)],                 # head accumulator
        compiler_params=pltpu.CompilerParams(
            dimension_semantics=("parallel", "parallel", "arbitrary"),
            vmem_limit_bytes=vmem_limit_bytes),
    )(xq, k_heads, wp, wo_t, bo)


def _reference(inputs_q, inputs_kv, w_proj, w_out, b_out, *, num_heads, head_dim):
    """Pure-JAX replica of the PyTorch forward (for verification)."""
    B, Lq, M = inputs_q.shape
    Lk = inputs_kv.shape[1]
    q = (inputs_q @ w_proj.T).reshape(B, Lq, num_heads, head_dim)
    k = (inputs_kv @ w_proj.T).reshape(B, Lk, num_heads, head_dim)
    v = k
    s = jnp.einsum('bqhd,bkhd->bhqk', q, k)
    p = jax.nn.softmax(s, axis=-1)
    x = jnp.einsum('bhqk,bkhd->bqhd', p, v)
    return x.reshape(B, Lq, M) @ w_out.T + b_out


if __name__ == "__main__":
    # Small, deterministic config.
    B, Lq, Lk = 2, 8, 8
    num_heads, head_dim = 4, 8
    M = num_heads * head_dim  # 32

    key = jax.random.PRNGKey(0)
    k1, k2, k3, k4, k5 = jax.random.split(key, 5)

    inputs_q = jax.random.normal(k1, (B, Lq, M), dtype=jnp.float32)
    inputs_kv = jax.random.normal(k2, (B, Lk, M), dtype=jnp.float32)

    # Deterministic parameter init (xavier-uniform-like scale for weights).
    limit = (6.0 / (M + M)) ** 0.5
    w_proj = jax.random.uniform(k3, (M, M), jnp.float32, -limit, limit)
    w_out = jax.random.uniform(k4, (M, M), jnp.float32, -limit, limit)
    b_out = jax.random.uniform(k5, (M,), jnp.float32, -0.1, 0.1)

    ref = _reference(inputs_q, inputs_kv, w_proj, w_out, b_out,
                     num_heads=num_heads, head_dim=head_dim)

    # f32 compute path, one head per step (exact softmax normalization).
    out = multi_head_attention(inputs_q, inputs_kv, w_proj, w_out, b_out,
                               num_heads=num_heads, head_dim=head_dim,
                               heads_per_step=1, compute_dtype=jnp.float32)
    out = jax.block_until_ready(out)
    assert out.shape == (B, Lq, M)
    assert jnp.allclose(out, ref, rtol=2e-2, atol=2e-2), "f32 HP=1 mismatch vs reference"

    # f32 compute path, two heads per grid step (lane-dense projection output).
    out_hp2 = multi_head_attention(inputs_q, inputs_kv, w_proj, w_out, b_out,
                                   num_heads=num_heads, head_dim=head_dim,
                                   heads_per_step=2, compute_dtype=jnp.float32)
    out_hp2 = jax.block_until_ready(out_hp2)
    assert out_hp2.shape == (B, Lq, M)
    assert jnp.allclose(out_hp2, ref, rtol=2e-2, atol=2e-2), "f32 HP=2 mismatch vs reference"

    # bf16 MXU-input path (f32 accumulation, approx reciprocal) -- looser tolerance.
    out_bf16 = multi_head_attention(inputs_q, inputs_kv, w_proj, w_out, b_out,
                                    num_heads=num_heads, head_dim=head_dim,
                                    heads_per_step=2, compute_dtype=jnp.bfloat16)
    out_bf16 = jax.block_until_ready(out_bf16)
    assert out_bf16.shape == (B, Lq, M)
    assert jnp.allclose(out_bf16, ref, rtol=1.5e-1, atol=1.5e-1), "bf16 mismatch vs reference"

    print("KERNEL_OK")
</pallas_src>

<mosaic_0001>
module attributes {stable_mosaic.version = 11 : i64} {
  func.func @_mha_kernel(%arg0: i32, %arg1: i32, %arg2: i32, %arg3: memref<1x8x32xf32, #tpu.memory_space<vmem>>, %arg4: memref<1x1x8x8xf32, #tpu.memory_space<vmem>>, %arg5: memref<8x32xf32, #tpu.memory_space<vmem>>, %arg6: memref<8x32xf32, #tpu.memory_space<vmem>>, %arg7: memref<1x32xf32, #tpu.memory_space<vmem>>, %arg8: memref<1x8x32xf32, #tpu.memory_space<vmem>>, %arg9: memref<8x32xf32, #tpu.memory_space<vmem>>) attributes {dimension_semantics = [#tpu.dimension_semantics<parallel>, #tpu.dimension_semantics<parallel>, #tpu.dimension_semantics<arbitrary>], iteration_bounds = array<i64: 2, 1, 4>, scalar_prefetch = 0 : i64, scratch_operands = 1 : i64, tpu.core_type = #tpu.core_type<tc>, window_params = [{transform_indices = @transform_0, window_bounds = array<i64: 1, 8, 32>}, {transform_indices = @transform_1, window_bounds = array<i64: 1, 1, 8, 8>}, {transform_indices = @transform_2, window_bounds = array<i64: 8, 32>}, {transform_indices = @transform_3, window_bounds = array<i64: 8, 32>}, {pipeline_mode = #tpu.pipeline_mode<synchronous>, transform_indices = @transform_4, window_bounds = array<i64: 1, 32>}, {transform_indices = @transform_5, window_bounds = array<i64: 1, 8, 32>}]} {
    %c0 = arith.constant 0 : index
    %c0_0 = arith.constant 0 : index
    %c0_1 = arith.constant 0 : index
    %0 = vector.load %arg3[%c0, %c0_0, %c0_1] : memref<1x8x32xf32, #tpu.memory_space<vmem>>, vector<1x8x32xf32>
    %1 = vector.shape_cast %0 : vector<1x8x32xf32> to vector<8x32xf32>
    %c0_2 = arith.constant 0 : index
    %c0_3 = arith.constant 0 : index
    %2 = vector.load %arg5[%c0_2, %c0_3] : memref<8x32xf32, #tpu.memory_space<vmem>>, vector<8x32xf32>
    %c0_4 = arith.constant 0 : index
    %c0_5 = arith.constant 0 : index
    %3 = vector.load %arg6[%c0_4, %c0_5] : memref<8x32xf32, #tpu.memory_space<vmem>>, vector<8x32xf32>
    %cst = arith.constant dense<0.000000e+00> : vector<8x8xf32>
    %4 = tpu.matmul %1, %2, %cst {dimension_numbers = #tpu.dot_dimension_numbers<[1], [1], [0], [0], [0, 0, 1, 0], [], []>} : vector<8x32xf32>, vector<8x32xf32>, vector<8x8xf32> -> vector<8x8xf32>
    %c0_i32 = arith.constant 0 : i32
    %5 = arith.cmpi eq, %arg2, %c0_i32 : i32
    %6 = arith.extui %5 : i1 to i32
    %c0_i32_6 = arith.constant 0 : i32
    %7 = arith.cmpi ne, %6, %c0_i32_6 : i32
    scf.if %7 {
      %c0_21 = arith.constant 0 : index
      %c0_22 = arith.constant 0 : index
      %28 = vector.load %arg7[%c0_21, %c0_22] : memref<1x32xf32, #tpu.memory_space<vmem>>, vector<1x32xf32>
      %29 = vector.shape_cast %28 : vector<1x32xf32> to vector<1x32xf32>
      %30 = vector.broadcast %29 : vector<1x32xf32> to vector<8x32xf32>
      %c0_23 = arith.constant 0 : index
      %c0_24 = arith.constant 0 : index
      %31 = vector.load %arg9[%c0_23, %c0_24] : memref<8x32xf32, #tpu.memory_space<vmem>>, vector<8x32xf32>
      tpu.vector_store %arg9[%c0_23, %c0_24], %30 {strides = array<i32>} : memref<8x32xf32, #tpu.memory_space<vmem>>, vector<8x32xf32>,
    } else {
    }
    %c0_7 = arith.constant 0 : index
    %c0_8 = arith.constant 0 : index
    %c0_9 = arith.constant 0 : index
    %c0_10 = arith.constant 0 : index
    %8 = vector.load %arg4[%c0_7, %c0_8, %c0_9, %c0_10] : memref<1x1x8x8xf32, #tpu.memory_space<vmem>>, vector<1x1x8x8xf32>
    %9 = vector.shape_cast %8 : vector<1x1x8x8xf32> to vector<8x8xf32>
    %cst_11 = arith.constant dense<0.000000e+00> : vector<8x8xf32>
    %10 = tpu.matmul %4, %9, %cst_11 {dimension_numbers = #tpu.dot_dimension_numbers<[1], [1], [0], [0], [0, 0, 1, 0], [], []>} : vector<8x8xf32>, vector<8x8xf32>, vector<8x8xf32> -> vector<8x8xf32>
    %cst_12 = arith.constant dense<0xFF800000> : vector<8xf32>
    %11 = vector.multi_reduction <maximumf>, %10, %cst_12 [1] : vector<8x8xf32> to vector<8xf32>
    %12 = vector.shape_cast %11 : vector<8xf32> to vector<8x1xf32>
    %13 = vector.broadcast %12 : vector<8x1xf32> to vector<8x8xf32>
    %14 = arith.subf %10, %13 : vector<8x8xf32>
    %15 = math.exp %14 : vector<8x8xf32>
    %cst_13 = arith.constant dense<0.000000e+00> : vector<8xf32>
    %16 = vector.multi_reduction <add>, %15, %cst_13 [1] : vector<8x8xf32> to vector<8xf32>
    %17 = vector.shape_cast %16 : vector<8xf32> to vector<8x1xf32>
    %cst_14 = arith.constant dense<0.000000e+00> : vector<8x8xf32>
    %18 = tpu.matmul %15, %9, %cst_14 {dimension_numbers = #tpu.dot_dimension_numbers<[1], [0], [0], [1], [0, 0, 1, 1], [], []>} : vector<8x8xf32>, vector<8x8xf32>, vector<8x8xf32> -> vector<8x8xf32>
    %19 = vector.broadcast %17 : vector<8x1xf32> to vector<8x8xf32>
    %20 = arith.divf %18, %19 : vector<8x8xf32>
    %c0_15 = arith.constant 0 : index
    %c0_16 = arith.constant 0 : index
    %21 = vector.load %arg9[%c0_15, %c0_16] : memref<8x32xf32, #tpu.memory_space<vmem>>, vector<8x32xf32>
    %cst_17 = arith.constant dense<0.000000e+00> : vector<8x32xf32>
    %22 = tpu.matmul %20, %3, %cst_17 {dimension_numbers = #tpu.dot_dimension_numbers<[1], [0], [0], [1], [0, 0, 1, 1], [], []>} : vector<8x8xf32>, vector<8x32xf32>, vector<8x32xf32> -> vector<8x32xf32>
    %23 = arith.addf %21, %22 : vector<8x32xf32>
    %c0_18 = arith.constant 0 : index
    %c0_19 = arith.constant 0 : index
    %24 = vector.load %arg9[%c0_18, %c0_19] : memref<8x32xf32, #tpu.memory_space<vmem>>, vector<8x32xf32>
    tpu.vector_store %arg9[%c0_18, %c0_19], %23 {strides = array<i32>} : memref<8x32xf32, #tpu.memory_space<vmem>>, vector<8x32xf32>,
    %c3_i32 = arith.constant 3 : i32
    %25 = arith.cmpi eq, %arg2, %c3_i32 : i32
    %26 = arith.extui %25 : i1 to i32
    %c0_i32_20 = arith.constant 0 : i32
    %27 = arith.cmpi ne, %26, %c0_i32_20 : i32
    scf.if %27 {
      %c0_21 = arith.constant 0 : index
      %c0_22 = arith.constant 0 : index
      %28 = vector.load %arg9[%c0_21, %c0_22] : memref<8x32xf32, #tpu.memory_space<vmem>>, vector<8x32xf32>
      %c0_23 = arith.constant 0 : index
      %c0_24 = arith.constant 0 : index
      %c0_25 = arith.constant 0 : index
      %29 = vector.load %arg8[%c0_23, %c0_24, %c0_25] : memref<1x8x32xf32, #tpu.memory_space<vmem>>, vector<1x8x32xf32>
      %30 = vector.shape_cast %29 : vector<1x8x32xf32> to vector<8x32xf32>
      %31 = vector.shape_cast %28 : vector<8x32xf32> to vector<1x8x32xf32>
      tpu.vector_store %arg8[%c0_23, %c0_24, %c0_25], %31 {strides = array<i32>} : memref<1x8x32xf32, #tpu.memory_space<vmem>>, vector<1x8x32xf32>,
    } else {
    }
    return
  }
  func.func @transform_0(%arg0: i32, %arg1: i32, %arg2: i32) -> (i32, i32, i32) {
    %c0_i32 = arith.constant 0 : i32
    %c0_i32_0 = arith.constant 0 : i32
    return %arg0, %arg1, %c0_i32 : i32, i32, i32
  }
  func.func @transform_1(%arg0: i32, %arg1: i32, %arg2: i32) -> (i32, i32, i32, i32) {
    %c0_i32 = arith.constant 0 : i32
    %c0_i32_0 = arith.constant 0 : i32
    %c0_i32_1 = arith.constant 0 : i32
    return %arg0, %arg2, %c0_i32, %c0_i32_0 : i32, i32, i32, i32
  }
  func.func @transform_2(%arg0: i32, %arg1: i32, %arg2: i32) -> (i32, i32) {
    %c0_i32 = arith.constant 0 : i32
    %c0_i32_0 = arith.constant 0 : i32
    return %arg2, %c0_i32 : i32, i32
  }
  func.func @transform_3(%arg0: i32, %arg1: i32, %arg2: i32) -> (i32, i32) {
    %c0_i32 = arith.constant 0 : i32
    %c0_i32_0 = arith.constant 0 : i32
    return %arg2, %c0_i32 : i32, i32
  }
  func.func @transform_4(%arg0: i32, %arg1: i32, %arg2: i32) -> (i32, i32) {
    %c0_i32 = arith.constant 0 : i32
    %c0_i32_0 = arith.constant 0 : i32
    %c0_i32_1 = arith.constant 0 : i32
    return %c0_i32, %c0_i32_0 : i32, i32
  }
  func.func @transform_5(%arg0: i32, %arg1: i32, %arg2: i32) -> (i32, i32, i32) {
    %c0_i32 = arith.constant 0 : i32
    %c0_i32_0 = arith.constant 0 : i32
    return %arg0, %arg1, %c0_i32 : i32, i32, i32
  }
}

</mosaic_0001>

<bundles_post_ra>
// kernel: tpu_custom_call.1
= control target key start
LH: loop header
LB: loop body
LE: loop exit
PB: predicated region body
PF: predicated region fallthrough
CT: control target
= control target key end

     0   :  { %s1755_s0 = inlined_call_operand.hbm [shape: f32[2,8,32], index: 0, kind: input, shape index: {}]   ;;  %s1756_s1 = inlined_call_operand.hbm [shape: f32[2,4,8,8], index: 1, kind: input, shape index: {}]   ;;  %s1757_s2 = inlined_call_operand.hbm [shape: f32[32,32], index: 2, kind: input, shape index: {}]   ;;  %s1758_s3 = inlined_call_operand.hbm [shape: f32[32,32], index: 3, kind: input, shape index: {}]   ;;  %s1759_s4 = inlined_call_operand.vmem [shape: f32[1,32], index: 4, kind: input, shape index: {}]   ;;  %s1760_s5 = inlined_call_operand.hbm [shape: f32[2,8,32], index: 5, kind: output, shape index: {}]  }
   0x1   :  { %1773 = sst [smem:[#allocation28_spill]] %s1755_s0 }
   0x2   :  { %1774 = sst [smem:[#allocation29_spill]] %s1756_s1 }
   0x3   :  { %1775 = sst [smem:[#allocation30_spill]] %s1757_s2 }
   0x4   :  { %1776 = sst [smem:[#allocation31_spill]] %s1758_s3 }
   0x5   :  { %1777 = sst [smem:[#allocation32_spill]] %s1759_s4 }
   0x6   :  { %1778 = sst [smem:[#allocation33_spill]] %s1760_s5 }
   0x7   :  { %10 = vsyncpa [#allocation4], 0 }
   0x8   :  { %12 = vsyncpa [#allocation4 + $0x1], 0 }
   0x9   :  { %13 = vsyncpa [#allocation7], 0 }
   0xa   :  { %15 = vsyncpa [#allocation7 + $0x1], 0 }
   0xb   :  { %16 = vsyncpa [#allocation10], 0 }
   0xc   :  { %18 = vsyncpa [#allocation10 + $0x1], 0 }
   0xd   :  { %19 = vsyncpa [#allocation5], 0 }
   0xe   :  { %21 = vsyncpa [#allocation5 + $0x1], 0  ;;  %s1395_s18 = smov 0   ;;  %s1397_s19 = smov 0  }
   0xf   :  { %s1399_s20 = smov 0   ;;  %s1401_s21 = smov 0  }
  0x10   :  { %s1403_s22 = smov 0   ;;  %s1405_s23 = smov 0  }
  0x11   :  { %s1407_s24 = smov 0   ;;  %s1409_s25 = smov 0  }
  0x12   :  { %s1411_s26 = smov 0   ;;  %s1413_s27 = smov 0  }
  0x13   :  { %s1415_s28 = smov 0   ;;  %s1417_s29 = smov 0  }
  0x14   :  { %s1419_s30 = smov 0   ;;  %s1421_s6 = smov 0  }
  0x15 LB: > { %1779 = sst [smem:[#allocation17_spill]] %s1320_s22  ;;  %s1464_s7 = sadd.s32 4294967295, %s1356_s6   ;;  %s1356_s6 = sphi %s1421_s6, %s27_s6   ;;  %s1352_s30 = sphi %s1419_s30, %s1837_s30   ;;  %s1348_s29 = sphi %s1417_s29, %s1826_s29   ;;  %s1344_s28 = sphi %s1415_s28, %s1825_s28   ;;  %s1340_s27 = sphi %s1413_s27, %s1824_s27   ;;  %s1336_s26 = sphi %s1411_s26, %s1836_s26   ;;  %s1332_s25 = sphi %s1409_s25, %s1835_s25   ;;  %s1328_s24 = sphi %s1407_s24, %s1834_s24   ;;  %s1324_s23 = sphi %s1405_s23, %s1833_s23   ;;  %s1320_s22 = sphi %s1403_s22, %s1832_s22   ;;  %s1316_s21 = sphi %s1401_s21, %s1820_s21   ;;  %s1312_s20 = sphi %s1399_s20, %s1831_s20   ;;  %s1308_s19 = sphi %s1397_s19, %s1830_s19   ;;  %s1304_s18 = sphi %s1395_s18, %s1829_s18  }
  0x16   : > { %1780 = sst [smem:[#allocation18_spill]] %s1336_s26  ;;  %s39_s8 = sadd.s32 1, %s1348_s29 }
  0x17   : > { %1781 = sst [smem:[#allocation19_spill]] %s1340_s27  ;;  %p40_p0 = scmp.ge.s32.totalorder %s39_s8, 4 }
  0x18   : > { %1782 = sst [smem:[#allocation20_spill]] %s1344_s28  ;;  %s46_s9 = sadd.s32 1, %s1352_s30 }
  0x19   : > { %1783 = sst [smem:[#allocation21_spill]] %s1348_s29  ;;  %p1771_p1 = scmp.eq.s32.totalorder %s1356_s6, 0 }
  0x1a   : > { %1784 = sst [smem:[#allocation22_spill]] %s1352_s30  ;;  %p1768_p2 = scmp.eq.s32.totalorder %s1464_s7, 0 }
  0x1b   : > { %s1839_s8 = smov (%p40_p0, %s39_s8), 0  ;;  %s1841_s9 = smov (!%p40_p0, %s46_s9), %s1352_s30 }
  0x1c   : > { %1785 = sst [smem:[#allocation23_spill]] %s1839_s8  ;;  %s1475_s10 = ssub.s32 %s1348_s29, %s1839_s8 }
  0x1d   : > { %s83_s11 = sadd.s32 1, %s1324_s23  ;;  %p48_p3 = scmp.ge.s32.totalorder %s1841_s9, 2 }
  0x1e   : > { %p90_p4 = scmp.ne.s32.totalorder %s1324_s23, %s1320_s22  ;;  %p96_p5 = scmp.ne.s32.totalorder %s1320_s22, %s1316_s21 }
  0x1f   : > { %s1843_s9 = smov (%p48_p3, %s1841_s9), 0  ;;  %p1767_p11 = scmp.lt.s32.totalorder %s1356_s6, 8 }
  0x20   : > { %1786 = sst [smem:[#allocation24_spill]] %s1843_s9  ;;  %p1486_p7 = por %p90_p4, %p1771_p1 }
  0x21   : > { %p1492_p8 = por %p96_p5, %p1768_p2  ;;  %s1498_s14 = ssub.s32 %s1352_s30, %s1843_s9 }
  0x22   : > { %p53_p9 = scmp.eq.s32.totalorder %s1498_s14, 0  ;;  %s80_s15 = sor.u32 %s1475_s10, %s1498_s14 }
  0x23   : > { %s1788_s13 = scalar_select %p1492_p8, 1, 0 }
  0x24   : > { %p81_p10 = scmp.eq.s32.totalorder %s80_s15, 0  ;;  %s243_s16 = sand.u32 1, %s1356_s6  }
  0x25   : > { %1789 = sst [smem:[#allocation25_spill]] %s1788_s13  ;;  %s245_s17 = sand.u32 1, %s1324_s23  }
  0x26   : > { %s1507_s21 = scalar_select %p81_p10, %s1324_s23, %s83_s11  }
  0x27   : > { %s887_s8 = sshll.u32 %s245_s17, 3  ;;  %s888_s5 = sshll.u32 %s1352_s30, 2 }
  0x28   : > { %1790 = sst [smem:[#allocation26_spill]] %s1507_s21  ;;  %s252_s28 = sadd.s32 %s1348_s29, %s888_s5 }
  0x29   : > { %s247_s4 = scalar_lea.vmem [#allocation6], %s887_s8  ;;  %s889_s27 = sshll.u32 %s252_s28, 7 }
  0x2a   : > { %s256_s9 = sshll.u32 %s247_s4, 4  ;;  %s1791_s1 = sld [smem:[#allocation29_spill]]  ;;  %s257_s9 = int_to_ptr.vmem [resolvable:$true] %s256_s9 }
  0x2b   : > { %p1518_p12 = pnand %p1767_p11, %p1486_p7  ;;  %p894_p13 = scmp.ge.s32.totalorder %s1356_s6, 1 }
  0x2c   : > { %p297_p0 = scmp.lt.s32.totalorder %s1356_s6, 9  ;;  %s1524_s11 = scalar_lea.sflag [#allocation7], %s243_s16 }
  0x2d   : > { %p1090_p3 = pneg %p1518_p12  ;;  %s1101_s4 = scalar_lea.vmem %s257_s9, 128 }
  0x2e   : > { %p1102_p4 = scmp.ne.s32.totalorder %s257_s9, %s1101_s4  ;;  %s1358_s5 = smov [#allocation6]  }
  0x2f   : > { %s1106_s22 = sshll.u32 %s1358_s5, 4  ;;  %s1107_s22 = int_to_ptr.vmem [resolvable:$false] %s1106_s22 }
  0x30   : > { %s254_s3 = scalar_lea.hbm %s1791_s1, %s889_s27  ;;  %p1104_p5 = pnand %p1102_p4, %p1090_p3 }
  0x31   : > { %s1108_s27 = scalar_lea.vmem %s1107_s22, 256  ;;  %p1109_p6 = scmp.lt.s32.totalorder %s257_s9, %s1107_s22 }
  0x32   : > { %p1105_p10 = pneg %p1104_p5  ;;  %p1110_p7 = scmp.lt.s32.totalorder %s1108_s27, %s1101_s4 }
  0x34   : > { %p1111_p11 = por %p1110_p7, %p1109_p6 }
  0x36   : > { %p1112_p2 = pnand %p1111_p11, %p1105_p10 }
  0x38   : > { %1115 = shalt.err (!%p1112_p2)
}
  0x39   : > { %957 = dma.hbm_to_vmem [thread:$0]  (!%p1518_p12), %s254_s3, 128, %s257_s9, %s1524_s11  }
  0x3a   : > { %p1535_p2 = pnand %p894_p13, %p297_p0  ;;  %s882_s8 = sadd.s32 4294967294, %s1356_s6  }
  0x3b   : > { %s55_s12 = sadd.s32 1, %s1336_s26  ;;  %p62_p6 = scmp.ne.s32.totalorder %s1336_s26, %s1332_s25 }
  0x3c   : > { %s1544_s13 = scalar_select %p53_p9, %s1336_s26, %s55_s12  }
  0x3d   : > { %p68_p11 = scmp.ne.s32.totalorder %s1332_s25, %s1328_s24  ;;  %p195_p3 = scmp.eq.s32.totalorder %s1464_s7, 7 }
  0x3e   : > { %1794 = sst [smem:[#allocation27_spill]] %s1544_s13  ;;  %p201_p4 = scmp.eq.s32.totalorder %s882_s8, 7 }
  0x3f   : > { %p64_p5 = por %p1771_p1, %p62_p6  ;;  %p1795_p10 = scmp.eq.s32.totalorder %s1464_s7, 0 }
  0x40   : > { %p1559_p13 = por %p195_p3, %p62_p6  ;;  %p1563_p0 = por %p201_p4, %p68_p11 }
  0x41   : > { %p1555_p12 = por %p1795_p10, %p68_p11  ;;  %s224_s16 = sand.u32 1, %s1336_s26  }
  0x42   : > { %s1798_s14 = scalar_select %p1563_p0, 1, 0 }
  0x43   : > { %s886_s17 = sshll.u32 %s1352_s30, 7  ;;  %s885_s15 = sshll.u32 %s224_s16, 3 }
  0x44   : > { %s1799_s0 = sld [smem:[#allocation28_spill]]  ;;  %s228_s27 = scalar_lea.vmem [#allocation3], %s885_s15 }
  0x45   : > { %s236_s8 = sshll.u32 %s228_s27, 4  ;;  %p1800_p9 = scmp.lt.s32.totalorder %s1356_s6, 8  ;;  %s237_s8 = int_to_ptr.vmem [resolvable:$true] %s236_s8 }
  0x46   : > { %s225_s1 = scalar_lea.sflag [#allocation4], %s224_s16  ;;  %s1129_s13 = scalar_lea.vmem %s237_s8, 128 }
  0x47   : > { %p1574_p7 = pnand %p1800_p9, %p64_p5  ;;  %p1130_p11 = scmp.ne.s32.totalorder %s237_s8, %s1129_s13 }
  0x48   : > { %s1359_s30 = smov [#allocation3]  }
  0x49   : > { %p1118_p6 = pneg %p1574_p7  ;;  %s1134_s26 = sshll.u32 %s1359_s30, 4  ;;  %s1135_s26 = int_to_ptr.vmem [resolvable:$false] %s1134_s26 }
  0x4a   : > { %s234_s22 = scalar_lea.hbm %s1799_s0, %s886_s17  ;;  %s1136_s17 = scalar_lea.vmem %s1135_s26, 256 }
  0x4b   : > { %p1132_p3 = pnand %p1130_p11, %p1118_p6  ;;  %p1137_p10 = scmp.lt.s32.totalorder %s237_s8, %s1135_s26 }
  0x4c   : > { %p1138_p1 = scmp.lt.s32.totalorder %s1136_s17, %s1129_s13 }
  0x4d   : > { %p1133_p4 = pneg %p1132_p3 }
  0x4e   : > { %p1139_p0 = por %p1138_p1, %p1137_p10 }
  0x50   : > { %p1140_p5 = pnand %p1139_p0, %p1133_p4 }
  0x52   : > { %1143 = shalt.err (!%p1140_p5)
}
  0x53   : > { %954 = dma.hbm_to_vmem [thread:$0]  (!%p1574_p7), %s234_s22, 128, %s237_s8, %s225_s1  }
  0x54   : > { %s109_s26 = sadd.s32 1, %s1312_s20  ;;  %p116_p9 = scmp.ne.s32.totalorder %s1312_s20, %s1308_s19 }
  0x55   : > { %p1802_p1 = scmp.eq.s32.totalorder %s1475_s10, 0  ;;  %p1803_p0 = scmp.eq.s32.totalorder %s1356_s6, 0 }
  0x56   : > { %p122_p11 = scmp.ne.s32.totalorder %s1308_s19, %s1304_s18  ;;  %s265_s13 = sand.u32 1, %s1312_s20  }
  0x57   : > { %s1588_s30 = scalar_select %p1802_p1, %s1312_s20, %s109_s26  }
  0x58   : > { %p118_p6 = por %p116_p9, %p1803_p0  ;;  %s891_s16 = sshll.u32 %s1348_s29, 7 }
  0x59   : > { %p1804_p3 = scmp.eq.s32.totalorder %s1464_s7, 0  ;;  %s890_s4 = sshll.u32 %s265_s13, 3 }
  0x5a   : > { %s1806_s2 = sld [smem:[#allocation30_spill]]  ;;  %s267_s22 = scalar_lea.vmem [#allocation8], %s890_s4 }
  0x5b   : > { %p1598_p4 = por %p122_p11, %p1804_p3  ;;  %s274_s8 = sshll.u32 %s267_s22, 4  ;;  %s275_s8 = int_to_ptr.vmem [resolvable:$true] %s274_s8 }
  0x5c   : > { %p1807_p7 = scmp.lt.s32.totalorder %s1356_s6, 8  ;;  %s1157_s18 = scalar_lea.vmem %s275_s8, 128 }
  0x5d   : > { %p1158_p9 = scmp.ne.s32.totalorder %s275_s8, %s1157_s18  ;;  %s1360_s12 = smov [#allocation8]  }
  0x5e   : > { %p1607_p10 = pnand %p1807_p7, %p118_p6  ;;  %s1162_s17 = sshll.u32 %s1360_s12, 4  ;;  %s1163_s17 = int_to_ptr.vmem [resolvable:$false] %s1162_s17 }
  0x5f   : > { %s1164_s26 = scalar_lea.vmem %s1163_s17, 256  ;;  %p1165_p11 = scmp.lt.s32.totalorder %s275_s8, %s1163_s17 }
  0x60   : > { %s272_s1 = scalar_lea.hbm %s1806_s2, %s891_s16  ;;  %p1146_p5 = pneg %p1607_p10 }
  0x61   : > { %p1166_p6 = scmp.lt.s32.totalorder %s1164_s26, %s1157_s18 }
  0x62   : > { %p1160_p1 = pnand %p1158_p9, %p1146_p5 }
  0x63   : > { %p1167_p3 = por %p1166_p6, %p1165_p11 }
  0x64   : > { %p1161_p0 = pneg %p1160_p1 }
  0x66   : > { %p1168_p7 = pnand %p1167_p3, %p1161_p0 }
  0x68   : > { %1171 = shalt.err (!%p1168_p7)
}
  0x69   : > { %960 = dma.hbm_to_vmem [thread:$0]  (!%p1607_p10), %s272_s1, 128, %s275_s8, %s1524_s11  }
  0x6a   : > { %s1809_s22 = sld [smem:[#allocation31_spill]]  ;;  %s285_s2 = scalar_lea.vmem [#allocation9], %s890_s4 }
  0x6b   : > { %s292_s29 = sshll.u32 %s285_s2, 4  ;;  %s282_s12 = scalar_lea.sflag [#allocation10], %s265_s13  ;;  %s293_s29 = int_to_ptr.vmem [resolvable:$true] %s292_s29 }
  0x6c   : > { %s1185_s21 = scalar_lea.vmem %s293_s29, 128  ;;  %s1361_s18 = smov [#allocation9]  }
  0x6d   : > { %p1186_p9 = scmp.ne.s32.totalorder %s293_s29, %s1185_s21  ;;  %s1190_s17 = sshll.u32 %s1361_s18, 4  ;;  %s1191_s17 = int_to_ptr.vmem [resolvable:$false] %s1190_s17 }
  0x6e   : > { %s1192_s26 = scalar_lea.vmem %s1191_s17, 256  ;;  %p1193_p11 = scmp.lt.s32.totalorder %s293_s29, %s1191_s17 }
  0x6f   : > { %p1188_p1 = pnand %p1186_p9, %p1146_p5  ;;  %p1194_p6 = scmp.lt.s32.totalorder %s1192_s26, %s1185_s21 }
  0x70   : > { %s290_s0 = scalar_lea.hbm %s1809_s22, %s891_s16 }
  0x71   : > { %p1189_p0 = pneg %p1188_p1  ;;  %p1195_p3 = por %p1194_p6, %p1193_p11 }
  0x73   : > { %p1196_p7 = pnand %p1195_p3, %p1189_p0 }
  0x75   : > { %1199 = shalt.err (!%p1196_p7)
}
  0x76   : > { %963 = dma.hbm_to_vmem [thread:$0]  (!%p1607_p10), %s290_s0, 128, %s293_s29, %s282_s12  }
  0x77   : > { %301 = sbr.rel (%p1535_p2) target bundleno = 1120 (0x460), region = 40  ;;  %s1630_s2 = sand.u32 (!%p1535_p2), 1, %s1332_s25  }
  0x78   : > { %s895_s11 = sshll.u32 (!%p1535_p2), %s1630_s2, 3  ;;  %s304_s13 = scalar_lea.sflag (!%p1535_p2), [#allocation4], %s1630_s2 }
  0x79   : > { %s307_s21 = scalar_lea.vmem (!%p1535_p2), [#allocation3], %s895_s11 }
  0x7c   : > { %1283 = dma.done.wait (%p1555_p12), %s304_s13, 128  }
  0x7d   : > { %1285 = vsyncadd (%p1555_p12), %s304_s13, 4294967168  ;;  %s1810_s0 = sld [smem:[#allocation17_spill]]  ;;  %s312_s28 = sand.u32 1, %s1464_s7  }
  0x7e   : > { %s313_s1 = scalar_lea.sflag [#allocation7], %s312_s28 }
  0x83   : > { %s314_s16 = sand.u32 1, %s1810_s0  }
  0x84   : > { %s1642_s4 = sshll.u32 %s314_s16, 3 }
  0x85   : > { %s316_s8 = scalar_lea.vmem [#allocation6], %s1642_s4 }
  0x86   : > { %1287 = dma.done.wait (%p1492_p8), %s313_s1, 128  }
  0x87   : > { %1289 = vsyncadd (%p1492_p8), %s313_s1, 4294967168  ;;  %s323_s10 = sand.u32 1, %s1308_s19  }
  0x88   : > { %s897_s3 = sshll.u32 %s323_s10, 3 }
  0x89   : > { %s325_s5 = scalar_lea.vmem [#allocation8], %s897_s3 }
  0x8a   : > { %1291 = dma.done.wait (%p1598_p4), %s313_s1, 128  }
  0x8b   : > { %1293 = vsyncadd (%p1598_p4), %s313_s1, 4294967168  ;;  %s331_s7 = scalar_lea.sflag [#allocation10], %s323_s10  ;;  %s334_s27 = scalar_lea.vmem [#allocation9], %s897_s3 }
  0x8c   : > { %1295 = dma.done.wait (%p1598_p4), %s331_s7, 128  }
  0x8d   : > { %1297 = vsyncadd (%p1598_p4), %s331_s7, 4294967168  ;;  %v1362_v0 = vmov 0.0   ;;  %vm1363_vm0 = vmmov 0   ;;  %vm379_vm1 = vcmask 261120   ;;  %v378_v1 = vld [vmem:[%s334_s27] sm:$0xff]  ;;  %v377_v2 = vld [vmem:[%s325_s5] sm:$0xff] }
  0x8e   : > { %921 = vmatprep.subr.mxu0 %v1362_v0  ;;  %923 = vmatprep.mubr.msk.f32.mxu0 %vm1363_vm0, %v1362_v0  ;;  %v376_v3 = vld [vmem:[%s307_s21] sm:$0xff]  ;;  %s1663_s22 = scalar_lea.vmem [#allocation11], %s895_s11  ;;  %s1812_s15 = sld [smem:[#allocation19_spill]] }
  0x8f   : > { %922 = vmatpush3.xpose.msk.msra.mxu0 %vm379_vm1, %v377_v2 }
  0x92   : > { %924 = vmatmul.mubr.msk.f32.vlgmr.msra.gmra.mxu0 %vm379_vm1, %v376_v3 }
  0x94   : > { %p902_p8 = scmp.ne.s32.totalorder %s1812_s15, 0 }
  0x95   : > { %s1813_s17 = sld [smem:[#allocation32_spill]] (!%p902_p8) }
 0x150   : > { %459 = sbr.rel (%p902_p8) target bundleno = 343 (0x157), region = 60 }
 0x152   : > { %v452_v4 = vpop.f32.mrf.mxu0 }
 0x154   : > { %v925_v5 = vpop.f32.mrf.mxu0 }
 0x155   : > { %v903_v6 = vld [vmem:[%s1813_s17] ss:$0 sm:$0xff] }
 0x156   : > { %467 = vst.msk [vmem:[#allocation2] sm:$0xff] %vm379_vm1, %v903_v6 }
 0x157 PF: > { %926 = vmatprep.subr.mxu1 %v1362_v0  ;;  %v468_v7 = vld [vmem:[%s316_s8] sm:$0xff]  ;;  %vm469_vm2 = vcmask 64512   ;;  %928 = vmatprep.mubr.msk.f32.mxu1 %vm1363_vm0, %v1362_v0  ;;  %s1814_s26 = sld [smem:[#allocation19_spill]] }
 0x158   : > { %927 = vmatpush3.xpose.msk.msra.mxu1 %vm469_vm2, %v468_v7  ;;  %931 = vmatprep.subr.mxu0 %v1362_v0 }
 0x159   : > { %932 = vmatpush3.msra.mxu0 %v468_v7  ;;  %933 = vmatprep.mubr.msk.f32.mxu0 %vm1363_vm0, %v1362_v0 }
 0x15a   : > { %936 = vmatprep.subr.mxu1 %v1362_v0 }
 0x15b   : > { %929 = vmatmul.mubr.msk.f32.vlgmr.msra.gmra.mxu1 %vm469_vm2, %v452_v4 }
 0x15c   : > { %937 = vmatpush3.msra.mxu1 %v378_v1  ;;  %938 = vmatprep.mubr.msk.f32.mxu1 %vm1363_vm0, %v1362_v0 }
 0x15d   : > { %v630_v21 = vld [vmem:[#allocation2] sm:$0xff]  ;;  %p908_p2 = scmp.ne.s32.totalorder %s1814_s26, 3 }
 0x21b   : > { %v542_v8 = vpop.f32.mrf.mxu1 }
 0x21c   : > { %v546_v9 = vsel %vm469_vm2, %v542_v8, -inf }
 0x21d   : > { %547 = vmax.xlane.f32.xlu0 %v546_v9  ;;  %v930_v10 = vpop.f32.mrf.mxu1 }
 0x2a6   : > { %v548_v11 = vpop.xlane.xlu0 %547 }
 0x2a7   : > { %v549_v12 = vsub.f32 %v542_v8, %v548_v11 }
 0x2a9   : > { %v550_v13 = vmul.f32 1.442695, %v549_v12 }
 0x2ab   : > { %1084 = vpow2.f32 %v550_v13 }
 0x2b8   : > { %v1085_v14 = vpop.eup %1084 }
 0x2b9   : > { %934 = vmatmul.mubr.msk.f32.vlgmr.msra.gmra.mxu0 %vm469_vm2, %v1085_v14  ;;  %v552_v15 = vsel %vm469_vm2, %v1085_v14, 0.0 }
 0x2ba   : > { %553 = vadd.xlane.f32.xlu0 %v552_v15 }
 0x343   : > { %v554_v16 = vpop.xlane.xlu0 %553 }
 0x344   : > { %1086 = vrcp.f32 %v554_v16 }
 0x351   : > { %v1087_v17 = vpop.eup %1086 }
 0x379   : > { %v624_v18 = vpop.f32.mrf.mxu0 }
 0x37a   : > { %v629_v19 = vmul.f32 %v1087_v17, %v624_v18 }
 0x37b   : > { %v935_v20 = vpop.f32.mrf.mxu0 }
 0x37c   : > { %939 = vmatmul.mubr.msk.f32.vlgmr.msra.gmra.mxu1 %vm469_vm2, %v629_v19 }
 0x43b   : > { %709 = sbr.rel (%p908_p2) target bundleno = 1096 (0x448), region = 64 }
 0x43c   : > { %v700_v22 = vpop.f32.mrf.mxu1 }
 0x43d   : > { %v704_v23 = vadd.f32 %v700_v22, %v630_v21 }
 0x43e   : > { %v940_v24 = vpop.f32.mrf.mxu1 }
 0x43f   : > { %705 = vst.msk [vmem:[#allocation2] sm:$0xff] %vm379_vm1, %v704_v23 }
 0x446   : > { %v710_v25 = vld [vmem:[#allocation2] sm:$0xff] }
 0x447   : > { %711 = vst.msk [vmem:[%s1663_s22] sm:$0xff] %vm379_vm1, %v710_v25 }
 0x448 PF: > { %s1815_s11 = sld [smem:[#allocation20_spill]]  ;;  %s727_s4 = sshll.u32 %s1663_s22, 4  ;;  %s728_s4 = int_to_ptr.vmem [resolvable:$true] %s727_s4 }
 0x449   : > { %s1816_s29 = sld [smem:[#allocation33_spill]]  ;;  %s713_s1 = scalar_lea.sflag [#allocation5], %s1630_s2 }
 0x44a   : > { %s1200_s8 = scalar_lea.vmem %s728_s4, 128  ;;  %s1364_s10 = smov [#allocation11]  }
 0x44b   : > { %p1201_p12 = scmp.ne.s32.totalorder %s728_s4, %s1200_s8  ;;  %s1204_s3 = sshll.u32 %s1364_s10, 4  ;;  %s1205_s3 = int_to_ptr.vmem [resolvable:$false] %s1204_s3 }
 0x44c   : > { %s1206_s5 = scalar_lea.vmem %s1205_s3, 256  ;;  %p1207_p5 = scmp.lt.s32.totalorder %s728_s4, %s1205_s3 }
 0x44d   : > { %p1202_p4 = pnand %p1201_p12, %p1559_p13  ;;  %p1208_p9 = scmp.lt.s32.totalorder %s1206_s5, %s1200_s8 }
 0x44e   : > { %s910_s13 = sshll.u32 %s1815_s11, 7 }
 0x44f   : > { %s1817_s16 = smov %s1816_s29  ;;  %s725_s28 = scalar_lea.hbm %s1816_s29, %s910_s13 }
 0x450   : > { %p1203_p10 = pneg %p1202_p4  ;;  %p1209_p1 = por %p1208_p9, %p1207_p5 }
 0x452   : > { %p1210_p0 = pnand %p1209_p1, %p1203_p10 }
 0x454   : > { %1213 = shalt.err (!%p1210_p0)
}
 0x455   : > { %s1214_s7 = scalar_lea.hbm %s725_s28, 128  ;;  %s1218_s22 = scalar_lea.hbm %s1817_s16, 256 }
 0x456   : > { %p1215_p11 = scmp.ne.s32.totalorder %s725_s28, %s1214_s7  ;;  %p1219_p7 = scmp.lt.s32.totalorder %s725_s28, %s1817_s16 }
 0x457   : > { %p1220_p8 = scmp.lt.s32.totalorder %s1218_s22, %s1214_s7 }
 0x458   : > { %p1216_p6 = pnand %p1215_p11, %p1559_p13 }
 0x459   : > { %p1221_p2 = por %p1220_p8, %p1219_p7 }
 0x45a   : > { %p1217_p3 = pneg %p1216_p6 }
 0x45c   : > { %p1222_p12 = pnand %p1221_p2, %p1217_p3 }
 0x45e   : > { %1225 = shalt.err (!%p1222_p12)
}
 0x45f   : > { %949 = dma.vmem_to_hbm [thread:$0]  (%p1559_p13), %s728_s4, 128, %s725_s28, %s713_s1  }
 0x460 PF: > { %p969_p4 = scmp.ge.s32.totalorder %s1356_s6, 2  ;;  %s739_s18 = sand.u32 1, %s1328_s24  }
 0x461   : > { %p1818_p10 = scmp.ne.s32.totalorder %s1798_s14, 0  ;;  %s740_s17 = scalar_lea.sflag [#allocation5], %s739_s18 }
 0x463   : > { %p965_p5 = pnand %p969_p4, %p1818_p10 }
 0x465   : > { %p966_p9 = pneg %p965_p5 }
 0x467   : > { %1299 = dma.done.wait (%p966_p9), %s740_s17, 128  }
 0x468   : > { %1301 = vsyncadd (%p966_p9), %s740_s17, 4294967168  ;;  %s27_s6 = sadd.s32 1, %s1356_s6   ;;  %s1820_s21 = sld [smem:[#allocation17_spill]] }
 0x469   : > { %p1708_p1 = scmp.ge.s32.totalorder %s27_s6, 10   ;;  %s1821_s9 = sld [smem:[#allocation26_spill]] }
 0x46a   : > { %s1822_s11 = sld [smem:[#allocation18_spill]]  ;;  %s1829_s18 = smov %s1308_s19 }
 0x46b   : > { %s1823_s14 = sld [smem:[#allocation27_spill]]  ;;  %s1830_s19 = smov %s1312_s20 }
 0x46c   : > { %s1824_s27 = sld [smem:[#allocation21_spill]]  ;;  %s1831_s20 = smov %s1588_s30 }
 0x46d   : > { %s1825_s28 = sld [smem:[#allocation22_spill]]  ;;  %s1832_s22 = smov %s1324_s23 }
 0x46e   : > { %s1826_s29 = sld [smem:[#allocation23_spill]]  ;;  %s1834_s24 = smov %s1332_s25 }
 0x46f   : > { %s1827_s13 = sld [smem:[#allocation24_spill]]  ;;  %s1833_s23 = smov %s1821_s9 }
 0x470   : > { %s1835_s25 = smov %s1822_s11 }
 0x471   : > { %s1836_s26 = smov %s1823_s14  ;;  %26 = sbr.rel (!%p1708_p1) target bundleno = 21 (0x15), region = 130 }
 0x475   : > { %s1837_s30 = smov %s1827_s13 }
 0x476   :  { %745 = vsyncpa [#allocation4], 1 }
 0x477   :  { %747 = vsyncpa [#allocation4 + $0x1], 1 }
 0x478   :  { %748 = vsyncpa [#allocation7], 1 }
 0x479   :  { %750 = vsyncpa [#allocation7 + $0x1], 1 }
 0x47a   :  { %751 = vsyncpa [#allocation10], 1 }
 0x47b   :  { %753 = vsyncpa [#allocation10 + $0x1], 1 }
 0x47c   :  { %754 = vsyncpa [#allocation5], 1 }
 0x47d   :  { %756 = vsyncpa [#allocation5 + $0x1], 1 }

</bundles_post_ra>
